<compile_context>
chip_gen: v6e
topology: v6e:2x2x1
jax: 0.10.0
libtpu: 0.0.40
codegen_flags: <defaults>
</compile_context>

<pallas_src>
import jax
import jax.numpy as jnp
from jax import lax
from jax.experimental import pallas as pl
from jax.experimental.pallas import tpu as pltpu


def _round_up(n: int, m: int) -> int:
    return ((n + m - 1) // m) * m


def mlp_kernel(x_ref, w1_ref, b1_ref, w2_ref, b2_ref, o_ref):
    # x_ref : (TB, IN)      bf16
    # w1_ref: (Hpad, IN)    bf16   (PyTorch (out, in) layout)
    # b1_ref: (1, Hpad)     f32
    # w2_ref: (Cpad, Hpad)  bf16
    # b2_ref: (1, Cpad)     f32
    # o_ref : (TB, Cpad)    f32

    # fc1: contract x dim 1 with w1 dim 1 -> (TB, Hpad), f32 accumulate on MXU.
    h = lax.dot_general(
        x_ref[...], w1_ref[...],
        dimension_numbers=(((1,), (1,)), ((), ())),
        preferred_element_type=jnp.float32,
    )
    # Bias + ReLU in f32 on the VPU.
    h = jnp.maximum(h + b1_ref[...], 0.0)

    # fc2: (TB, Hpad) x (Cpad, Hpad)^T -> (TB, Cpad), bf16 MXU operands.
    o = lax.dot_general(
        h.astype(jnp.bfloat16), w2_ref[...],
        dimension_numbers=(((1,), (1,)), ((), ())),
        preferred_element_type=jnp.float32,
    )
    o_ref[...] = (o + b2_ref[...]).astype(o_ref.dtype)


def mlp_forward(x_nchw, w1, b1, w2, b2, *, tb=512):
    """x_nchw: (B, 1, 28, 28) f32.
    w1: (H, 784), b1: (H,), w2: (C, H), b2: (C,)  (PyTorch nn.Linear layout)."""
    B = x_nchw.shape[0]
    H, IN = w1.shape
    C = w2.shape[0]

    Hpad = _round_up(H, 128)
    Cpad = _round_up(C, 128)
    TB = min(tb, _round_up(B, 8))          # batch tile, multiple of 8 sublanes
    Bpad = _round_up(B, TB)

    # x.view(-1, 28*28), zero-pad batch, bf16 for the MXU / halved DMA bytes.
    x2d = x_nchw.reshape(B, IN)
    x_p = jnp.zeros((Bpad, IN), jnp.bfloat16).at[:B, :].set(
        x2d.astype(jnp.bfloat16))

    # Zero-padded, lane-dense parameters (padded out-features produce zeros).
    w1_p = jnp.zeros((Hpad, IN), jnp.bfloat16).at[:H, :].set(
        w1.astype(jnp.bfloat16))
    b1_p = jnp.zeros((1, Hpad), jnp.float32).at[0, :H].set(b1)
    w2_p = jnp.zeros((Cpad, Hpad), jnp.bfloat16).at[:C, :H].set(
        w2.astype(jnp.bfloat16))
    b2_p = jnp.zeros((1, Cpad), jnp.float32).at[0, :C].set(b2)

    grid = (Bpad // TB,)

    cost = pl.CostEstimate(
        flops=2 * Bpad * (IN * Hpad + Hpad * Cpad),
        transcendentals=0,
        bytes_accessed=(x_p.size * 2 + w1_p.size * 2 + w2_p.size * 2
                        + b1_p.size * 4 + b2_p.size * 4 + Bpad * Cpad * 4),
    )

    y_pad = pl.pallas_call(
        mlp_kernel,
        out_shape=jax.ShapeDtypeStruct((Bpad, Cpad), jnp.float32),
        grid_spec=pltpu.PrefetchScalarGridSpec(
            num_scalar_prefetch=0,
            grid=grid,
            in_specs=[
                pl.BlockSpec((TB, IN), lambda i: (i, 0)),      # x tile (pipelined)
                pl.BlockSpec((Hpad, IN), lambda i: (0, 0)),    # w1 resident
                pl.BlockSpec((1, Hpad), lambda i: (0, 0)),     # b1 resident
                pl.BlockSpec((Cpad, Hpad), lambda i: (0, 0)),  # w2 resident
                pl.BlockSpec((1, Cpad), lambda i: (0, 0)),     # b2 resident
            ],
            out_specs=pl.BlockSpec((TB, Cpad), lambda i: (i, 0)),
        ),
        compiler_params=pltpu.CompilerParams(
            dimension_semantics=("parallel",),
            vmem_limit_bytes=32 * 1024 * 1024,
        ),
        cost_estimate=cost,
    )(x_p, w1_p, b1_p, w2_p, b2_p)

    # Strip batch / class padding.
    return y_pad[:B, :C]


if __name__ == "__main__":
    # Module hyperparameters (forward implies 28*28 input features).
    input_size = 28 * 28
    num_capas = 32      # hidden units
    num_clases = 10     # output classes
    batch = 2

    key = jax.random.PRNGKey(0)
    kx, kw1, kb1, kw2, kb2 = jax.random.split(key, 5)

    # Deterministic synthetic parameters (PyTorch Linear convention: (out, in)).
    w1 = jax.random.normal(kw1, (num_capas, input_size), jnp.float32) * 0.02
    b1 = jax.random.normal(kb1, (num_capas,), jnp.float32) * 0.02
    w2 = jax.random.normal(kw2, (num_clases, num_capas), jnp.float32) * 0.02
    b2 = jax.random.normal(kb2, (num_clases,), jnp.float32) * 0.02

    # Input in NCHW, like an MNIST batch.
    x = jax.random.normal(kx, (batch, 1, 28, 28), jnp.float32)

    y = mlp_forward(x, w1, b1, w2, b2)
    y = jax.block_until_ready(y)

    # Pure-JAX f32 reference (kernel uses bf16 MXU operands -> looser tol).
    x2d = x.reshape(batch, -1)
    ref = jnp.maximum(x2d @ w1.T + b1, 0.0) @ w2.T + b2
    assert y.shape == (batch, num_clases)
    assert jnp.allclose(y, ref, atol=1e-2, rtol=5e-2), "mismatch vs reference"

    print("KERNEL_OK")
</pallas_src>

<mosaic_0001>
module attributes {stable_mosaic.version = 11 : i64} {
  func.func @mlp_kernel(%arg0: i32, %arg1: memref<8x784xbf16, #tpu.memory_space<vmem>>, %arg2: memref<128x784xbf16, #tpu.memory_space<vmem>>, %arg3: memref<1x128xf32, #tpu.memory_space<vmem>>, %arg4: memref<128x128xbf16, #tpu.memory_space<vmem>>, %arg5: memref<1x128xf32, #tpu.memory_space<vmem>>, %arg6: memref<8x128xf32, #tpu.memory_space<vmem>>) attributes {dimension_semantics = [#tpu.dimension_semantics<parallel>], iteration_bounds = array<i64: 1>, scalar_prefetch = 0 : i64, scratch_operands = 0 : i64, tpu.core_type = #tpu.core_type<tc>, window_params = [{transform_indices = @transform_0, window_bounds = array<i64: 8, 784>}, {pipeline_mode = #tpu.pipeline_mode<synchronous>, transform_indices = @transform_1, window_bounds = array<i64: 128, 784>}, {pipeline_mode = #tpu.pipeline_mode<synchronous>, transform_indices = @transform_2, window_bounds = array<i64: 1, 128>}, {pipeline_mode = #tpu.pipeline_mode<synchronous>, transform_indices = @transform_3, window_bounds = array<i64: 128, 128>}, {pipeline_mode = #tpu.pipeline_mode<synchronous>, transform_indices = @transform_4, window_bounds = array<i64: 1, 128>}, {transform_indices = @transform_5, window_bounds = array<i64: 8, 128>}]} {
    %c0 = arith.constant 0 : index
    %c0_0 = arith.constant 0 : index
    %0 = vector.load %arg1[%c0, %c0_0] : memref<8x784xbf16, #tpu.memory_space<vmem>>, vector<8x784xbf16>
    %c0_1 = arith.constant 0 : index
    %c0_2 = arith.constant 0 : index
    %1 = vector.load %arg2[%c0_1, %c0_2] : memref<128x784xbf16, #tpu.memory_space<vmem>>, vector<128x784xbf16>
    %cst = arith.constant dense<0.000000e+00> : vector<8x128xf32>
    %2 = tpu.matmul %0, %1, %cst {dimension_numbers = #tpu.dot_dimension_numbers<[1], [1], [0], [0], [0, 0, 1, 0], [], []>} : vector<8x784xbf16>, vector<128x784xbf16>, vector<8x128xf32> -> vector<8x128xf32>
    %c0_3 = arith.constant 0 : index
    %c0_4 = arith.constant 0 : index
    %3 = vector.load %arg3[%c0_3, %c0_4] : memref<1x128xf32, #tpu.memory_space<vmem>>, vector<1x128xf32>
    %4 = vector.broadcast %3 : vector<1x128xf32> to vector<8x128xf32>
    %5 = arith.addf %2, %4 : vector<8x128xf32>
    %cst_5 = arith.constant 0.000000e+00 : f32
    %6 = vector.broadcast %cst_5 : f32 to vector<8x128xf32>
    %7 = arith.maximumf %5, %6 : vector<8x128xf32>
    %8 = arith.truncf %7 : vector<8x128xf32> to vector<8x128xbf16>
    %c0_6 = arith.constant 0 : index
    %c0_7 = arith.constant 0 : index
    %9 = vector.load %arg4[%c0_6, %c0_7] : memref<128x128xbf16, #tpu.memory_space<vmem>>, vector<128x128xbf16>
    %cst_8 = arith.constant dense<0.000000e+00> : vector<8x128xf32>
    %10 = tpu.matmul %8, %9, %cst_8 {dimension_numbers = #tpu.dot_dimension_numbers<[1], [1], [0], [0], [0, 0, 1, 0], [], []>} : vector<8x128xbf16>, vector<128x128xbf16>, vector<8x128xf32> -> vector<8x128xf32>
    %c0_9 = arith.constant 0 : index
    %c0_10 = arith.constant 0 : index
    %11 = vector.load %arg5[%c0_9, %c0_10] : memref<1x128xf32, #tpu.memory_space<vmem>>, vector<1x128xf32>
    %12 = vector.broadcast %11 : vector<1x128xf32> to vector<8x128xf32>
    %13 = arith.addf %10, %12 : vector<8x128xf32>
    %c0_11 = arith.constant 0 : index
    %c0_12 = arith.constant 0 : index
    %14 = vector.load %arg6[%c0_11, %c0_12] : memref<8x128xf32, #tpu.memory_space<vmem>>, vector<8x128xf32>
    tpu.vector_store %arg6[%c0_11, %c0_12], %13 {strides = array<i32>} : memref<8x128xf32, #tpu.memory_space<vmem>>, vector<8x128xf32>,
    return
  }
  func.func @transform_0(%arg0: i32) -> (i32, i32) {
    %c0_i32 = arith.constant 0 : i32
    %c0_i32_0 = arith.constant 0 : i32
    return %arg0, %c0_i32 : i32, i32
  }
  func.func @transform_1(%arg0: i32) -> (i32, i32) {
    %c0_i32 = arith.constant 0 : i32
    %c0_i32_0 = arith.constant 0 : i32
    %c0_i32_1 = arith.constant 0 : i32
    return %c0_i32, %c0_i32_0 : i32, i32
  }
  func.func @transform_2(%arg0: i32) -> (i32, i32) {
    %c0_i32 = arith.constant 0 : i32
    %c0_i32_0 = arith.constant 0 : i32
    %c0_i32_1 = arith.constant 0 : i32
    return %c0_i32, %c0_i32_0 : i32, i32
  }
  func.func @transform_3(%arg0: i32) -> (i32, i32) {
    %c0_i32 = arith.constant 0 : i32
    %c0_i32_0 = arith.constant 0 : i32
    %c0_i32_1 = arith.constant 0 : i32
    return %c0_i32, %c0_i32_0 : i32, i32
  }
  func.func @transform_4(%arg0: i32) -> (i32, i32) {
    %c0_i32 = arith.constant 0 : i32
    %c0_i32_0 = arith.constant 0 : i32
    %c0_i32_1 = arith.constant 0 : i32
    return %c0_i32, %c0_i32_0 : i32, i32
  }
  func.func @transform_5(%arg0: i32) -> (i32, i32) {
    %c0_i32 = arith.constant 0 : i32
    %c0_i32_0 = arith.constant 0 : i32
    return %arg0, %c0_i32 : i32, i32
  }
}

</mosaic_0001>

<bundles_post_ra>
// kernel: tpu_custom_call.1
= control target key start
LH: loop header
LB: loop body
LE: loop exit
PB: predicated region body
PF: predicated region fallthrough
CT: control target
= control target key end

     0   :  { %s1250_s0 = inlined_call_operand.vmem [shape: bf16[8,784], index: 0, kind: input, shape index: {}]   ;;  %s1251_s1 = inlined_call_operand.vmem [shape: bf16[128,784], index: 1, kind: input, shape index: {}]   ;;  %s1252_s2 = inlined_call_operand.vmem [shape: f32[1,128], index: 2, kind: input, shape index: {}]   ;;  %s1253_s3 = inlined_call_operand.vmem [shape: bf16[128,128], index: 3, kind: input, shape index: {}]   ;;  %s1254_s4 = inlined_call_operand.vmem [shape: f32[1,128], index: 4, kind: input, shape index: {}]   ;;  %s1255_s5 = inlined_call_operand.hbm [shape: f32[8,128], index: 5, kind: output, shape index: {}]  }
   0x1   :  { %v852_v0 = vld [vmem:[%s1251_s1 + $0x18c] ss:$28 sps:$4 sm:$0xff]   ;;  %v854_v1 = vld [vmem:[%s1251_s1 + $0x194] ss:$28 sps:$4 sm:$0xff]   ;;  %v860_v5 = vld [vmem:[%s1251_s1 + $0x15c] ss:$28 sps:$4 sm:$0xff]  }
   0x2   :  { %429 = vmatprep.subr.bf16.mxu0 %v852_v0  ;;  %v856_v2 = vld [vmem:[%s1251_s1 + $0x188] ss:$28 sps:$4 sm:$0xff]   ;;  %v857_v3 = vld [vmem:[%s1251_s1 + $0x190] ss:$28 sps:$4 sm:$0xff]   ;;  %469 = vmatprep.subr.bf16.mxu1 %v854_v1  ;;  %v863_v7 = vld [vmem:[%s1251_s1 + $0x158] ss:$28 sps:$4 sm:$0xff]  }
   0x3   :  { %v858_v4 = vld [vmem:[%s1251_s1 + $0x154] ss:$28 sps:$4 sm:$0xff]   ;;  %430 = vmatpush1.bf16.xpose.msra.mxu0 %v856_v2  ;;  %470 = vmatpush1.bf16.xpose.msra.mxu1 %v857_v3  ;;  %v864_v8 = vld [vmem:[%s1251_s1 + $0x11c] ss:$28 sps:$4 sm:$0xff]   ;;  %v866_v9 = vld [vmem:[%s1251_s1 + $0x124] ss:$28 sps:$4 sm:$0xff]  }
   0x4   :  { %431 = vmatprep.subr.bf16.mxu0 %v858_v4  ;;  %471 = vmatprep.subr.bf16.mxu1 %v860_v5  ;;  %v862_v6 = vld [vmem:[%s1251_s1 + $0x150] ss:$28 sps:$4 sm:$0xff]   ;;  %v868_v10 = vld [vmem:[%s1251_s1 + $0x118] ss:$28 sps:$4 sm:$0xff]   ;;  %v869_v11 = vld [vmem:[%s1251_s1 + $0x120] ss:$28 sps:$4 sm:$0xff]  }
   0x5   :  { %v870_v12 = vld [vmem:[%s1251_s1 + $0xe4] ss:$28 sps:$4 sm:$0xff]   ;;  %v872_v13 = vld [vmem:[%s1251_s1 + $0xec] ss:$28 sps:$4 sm:$0xff]   ;;  %v878_v21 = vld [vmem:[%s1251_s1 + $0xb4] ss:$28 sps:$4 sm:$0xff]  }
   0x6   :  { %v22_v14 = vld [vmem:[%s1250_s0] sm:$0xff]  ;;  %v23_v15 = vld [vmem:[%s1250_s0 + $0x8] sm:$0xff]  ;;  %v882_v24 = vld [vmem:[%s1251_s1 + $0x74] ss:$28 sps:$4 sm:$0xff]  }
   0x7   :  { %v719_v16 = vcombine.high %v22_v14, %v22_v14  ;;  %v721_v17 = vcombine.high %v23_v15, %v23_v15  ;;  %v874_v18 = vld [vmem:[%s1251_s1 + $0xe0] ss:$28 sps:$4 sm:$0xff]   ;;  %v875_v19 = vld [vmem:[%s1251_s1 + $0xe8] ss:$28 sps:$4 sm:$0xff]   ;;  %v881_v23 = vld [vmem:[%s1251_s1 + $0xb0] ss:$28 sps:$4 sm:$0xff]  }
   0x8   :  { %v876_v20 = vld [vmem:[%s1251_s1 + $0xac] ss:$28 sps:$4 sm:$0xff]   ;;  %v884_v25 = vld [vmem:[%s1251_s1 + $0x7c] ss:$28 sps:$4 sm:$0xff]   ;;  %v890_v29 = vld [vmem:[%s1251_s1 + $0x44] ss:$28 sps:$4 sm:$0xff]  }
   0x9   :  { %461 = vmatprep.mubr.bf16.mxu0 %v719_v16  ;;  %501 = vmatprep.mubr.bf16.mxu1 %v721_v17  ;;  %v880_v22 = vld [vmem:[%s1251_s1 + $0xa8] ss:$28 sps:$4 sm:$0xff]   ;;  %v886_v26 = vld [vmem:[%s1251_s1 + $0x70] ss:$28 sps:$4 sm:$0xff]   ;;  %v887_v27 = vld [vmem:[%s1251_s1 + $0x78] ss:$28 sps:$4 sm:$0xff]  }
   0xa   :  { %v888_v28 = vld [vmem:[%s1251_s1 + $0x3c] ss:$28 sps:$4 sm:$0xff]  }
   0xb   :  { %432 = vmatpush1.bf16.xpose.msra.mxu0 %v862_v6  ;;  %472 = vmatpush1.bf16.xpose.msra.mxu1 %v863_v7 }
   0xc   :  { %433 = vmatprep.subr.bf16.mxu0 %v864_v8  ;;  %473 = vmatprep.subr.bf16.mxu1 %v866_v9 }
  0x13   :  { %434 = vmatpush1.bf16.xpose.msra.mxu0 %v868_v10  ;;  %474 = vmatpush1.bf16.xpose.msra.mxu1 %v869_v11 }
  0x14   :  { %435 = vmatprep.subr.bf16.mxu0 %v870_v12  ;;  %475 = vmatprep.subr.bf16.mxu1 %v872_v13 }
  0x1b   :  { %436 = vmatpush1.bf16.xpose.msra.mxu0 %v874_v18  ;;  %476 = vmatpush1.bf16.xpose.msra.mxu1 %v875_v19 }
  0x1c   :  { %437 = vmatprep.subr.bf16.mxu0 %v876_v20  ;;  %477 = vmatprep.subr.bf16.mxu1 %v878_v21 }
  0x23   :  { %438 = vmatpush1.bf16.xpose.msra.mxu0 %v880_v22  ;;  %478 = vmatpush1.bf16.xpose.msra.mxu1 %v881_v23 }
  0x24   :  { %439 = vmatprep.subr.bf16.mxu0 %v882_v24  ;;  %479 = vmatprep.subr.bf16.mxu1 %v884_v25 }
  0x2b   :  { %440 = vmatpush1.bf16.xpose.msra.mxu0 %v886_v26  ;;  %480 = vmatpush1.bf16.xpose.msra.mxu1 %v887_v27 }
  0x2c   :  { %441 = vmatprep.subr.bf16.mxu0 %v888_v28  ;;  %481 = vmatprep.subr.bf16.mxu1 %v890_v29 }
  0x2d   :  { %10 = vsyncpa [#allocation3], 0  ;;  %v892_v30 = vld [vmem:[%s1251_s1 + $0x38] ss:$28 sps:$4 sm:$0xff]   ;;  %v893_v31 = vld [vmem:[%s1251_s1 + $0x40] ss:$28 sps:$4 sm:$0xff]   ;;  %v718_v39 = vcombine.low %v22_v14, %v22_v14  ;;  %v720_v40 = vcombine.low %v23_v15, %v23_v15 }
  0x2e   :  { %v894_v32 = vld [vmem:[%s1251_s1 + $0x4] ss:$28 sps:$4 sm:$0xff]   ;;  %v896_v33 = vld [vmem:[%s1251_s1 + $0xc] ss:$28 sps:$4 sm:$0xff]   ;;  %v906_v36 = vld [vmem:[%s1251_s1 + $0x19c] ss:$28 sps:$4 sm:$0xff]  }
  0x2f   :  { %v898_v34 = vld [vmem:[%s1251_s1] ss:$28 sps:$4 sm:$0xff]   ;;  %v899_v35 = vld [vmem:[%s1251_s1 + $0x8] ss:$28 sps:$4 sm:$0xff]   ;;  %v969_v37 = vmov 0.0   ;;  %vm401_vm0 = vcmask 130048  }
  0x30   :  { %v907_v38 = vld [vmem:[%s1251_s1 + $0x1a0] ss:$28 sps:$4 sm:$0xff]   ;;  %v1114_v41 = vld [vmem:[%s1250_s0 + $0x10] sm:$0xff]  ;;  %v911_v46 = vld [vmem:[%s1251_s1 + $0x168] ss:$28 sps:$4 sm:$0xff]   ;;  %vm970_vm1 = vmmov 0  }
  0x31   :  { %v904_v42 = vld [vmem:[%s1251_s1 + $0x198] ss:$28 sps:$4 sm:$0xff]   ;;  %v427_v43 = vsel %vm401_vm0, %v907_v38, 0  ;;  %v910_v44 = vld [vmem:[%s1251_s1 + $0x164] ss:$28 sps:$4 sm:$0xff]   ;;  %v723_v45 = vcombine.high %v1114_v41, %v1114_v41  ;;  %v424_v48 = vsel %vm401_vm0, %v911_v46, 0  ;;  %v722_v9 = vcombine.low %v1114_v41, %v1114_v41 }
  0x32   :  { %v908_v47 = vld [vmem:[%s1251_s1 + $0x160] ss:$28 sps:$4 sm:$0xff]   ;;  %v914_v49 = vld [vmem:[%s1251_s1 + $0x12c] ss:$28 sps:$4 sm:$0xff]   ;;  %v918_v53 = vld [vmem:[%s1251_s1 + $0xf4] ss:$28 sps:$4 sm:$0xff]  }
  0x33   :  { %442 = vmatpush1.bf16.xpose.msra.mxu0 %v892_v30  ;;  %482 = vmatpush1.bf16.xpose.msra.mxu1 %v893_v31  ;;  %v915_v50 = vld [vmem:[%s1251_s1 + $0x130] ss:$28 sps:$4 sm:$0xff]   ;;  %v912_v51 = vld [vmem:[%s1251_s1 + $0x128] ss:$28 sps:$4 sm:$0xff]   ;;  %v919_v54 = vld [vmem:[%s1251_s1 + $0xf8] ss:$28 sps:$4 sm:$0xff]  }
  0x34   :  { %443 = vmatprep.subr.bf16.mxu0 %v894_v32  ;;  %483 = vmatprep.subr.bf16.mxu1 %v896_v33  ;;  %v421_v52 = vsel %vm401_vm0, %v915_v50, 0  ;;  %v916_v55 = vld [vmem:[%s1251_s1 + $0xf0] ss:$28 sps:$4 sm:$0xff]   ;;  %v418_v56 = vsel %vm401_vm0, %v919_v54, 0  ;;  %v922_v57 = vld [vmem:[%s1251_s1 + $0xbc] ss:$28 sps:$4 sm:$0xff]  }
  0x35   :  { %v923_v58 = vld [vmem:[%s1251_s1 + $0xc0] ss:$28 sps:$4 sm:$0xff]   ;;  %v920_v59 = vld [vmem:[%s1251_s1 + $0xb8] ss:$28 sps:$4 sm:$0xff]   ;;  %v927_v62 = vld [vmem:[%s1251_s1 + $0x88] ss:$28 sps:$4 sm:$0xff]  }
  0x36   :  { %v415_v60 = vsel %vm401_vm0, %v923_v58, 0  ;;  %v926_v61 = vld [vmem:[%s1251_s1 + $0x84] ss:$28 sps:$4 sm:$0xff]   ;;  %v412_v0 = vsel %vm401_vm0, %v927_v62, 0  ;;  %v930_v1 = vld [vmem:[%s1251_s1 + $0x4c] ss:$28 sps:$4 sm:$0xff]  }
  0x37   :  { %v924_v63 = vld [vmem:[%s1251_s1 + $0x80] ss:$28 sps:$4 sm:$0xff]   ;;  %v931_v2 = vld [vmem:[%s1251_s1 + $0x50] ss:$28 sps:$4 sm:$0xff]   ;;  %v928_v3 = vld [vmem:[%s1251_s1 + $0x48] ss:$28 sps:$4 sm:$0xff]  }
  0x38   :  { %v409_v4 = vsel %vm401_vm0, %v931_v2, 0  ;;  %v934_v5 = vld [vmem:[%s1251_s1 + $0x14] ss:$28 sps:$4 sm:$0xff]   ;;  %v938_v10 = vld [vmem:[%s1250_s0 + $0x18] ss:$0 sps:$4 sm:$0xff]   ;;  %v941_v13 = vld [vmem:[%s1253_s3 + $0x28] sm:$0xff]  }
  0x39   :  { %v935_v6 = vld [vmem:[%s1251_s1 + $0x18] ss:$28 sps:$4 sm:$0xff]   ;;  %v932_v7 = vld [vmem:[%s1251_s1 + $0x10] ss:$28 sps:$4 sm:$0xff]   ;;  %v942_v14 = vld [vmem:[%s1253_s3 + $0x20] sm:$0xff]  }
  0x3a   :  { %v406_v8 = vsel %vm401_vm0, %v935_v6, 0  ;;  %v939_v11 = vld [vmem:[%s1253_s3 + $0x38] sm:$0xff]   ;;  %v940_v12 = vld [vmem:[%s1253_s3 + $0x30] sm:$0xff]   ;;  %v945_v17 = vld [vmem:[%s1253_s3 + $0x8] sm:$0xff]  }
  0x3b   :  { %444 = vmatpush1.bf16.xpose.msra.mxu0 %v898_v34  ;;  %484 = vmatpush1.bf16.xpose.msra.mxu1 %v899_v35  ;;  %v943_v15 = vld [vmem:[%s1253_s3 + $0x18] sm:$0xff]   ;;  %v944_v16 = vld [vmem:[%s1253_s3 + $0x10] sm:$0xff]   ;;  %v946_v18 = vld [vmem:[%s1253_s3] sm:$0xff]  }
  0x3c   :  { %509 = vmatprep.subr.bf16.mxu0 %v906_v36  ;;  %809 = vmatprep.subr.bf16.mxu1 %v969_v37  ;;  %v717_v27 = vld [vmem:[%s1252_s2] ss:$0 sm:$0xff]  ;;  %s971_s2 = smov [#allocation2]  }
  0x3d   :  { %s709_s30 = sshll.u32 %s971_s2, 4  ;;  %s710_s30 = int_to_ptr.vmem [resolvable:$true] %s709_s30 }
  0x3e   :  { %s947_s6 = scalar_lea.vmem %s710_s30, 128  ;;  %p952_p1 = scmp.lt.s32.totalorder %s710_s30, %s710_s30 }
  0x3f   :  { %p948_p0 = scmp.ne.s32.totalorder %s710_s30, %s947_s6  ;;  %p953_p2 = scmp.lt.s32.totalorder %s947_s6, %s947_s6 }
  0x41   :  { %p954_p3 = por %p953_p2, %p952_p1 }
  0x42   :  { %462 = vmatmul.mubr.bf16.vlgmr.msra.gmra.mxu0 %v718_v39  ;;  %502 = vmatmul.mubr.bf16.vlgmr.msra.gmra.mxu1 %v720_v40 }
  0x43   :  { %510 = vmatpush1.bf16.xpose.msra.mxu0 %v904_v42  ;;  %810 = vmatpush3.bf16.xpose.msra.mxu1 %v427_v43  ;;  %v782_v42 = vld [vmem:[%s1254_s4] ss:$0 sm:$0xff]  ;;  %p955_p4 = pnand %p954_p3, %p948_p0 }
  0x44   :  { %511 = vmatprep.subr.bf16.mxu0 %v910_v44  ;;  %811 = vmatprep.subr.bf16.mxu1 %v969_v37 }
  0x45   :  { %541 = vmatprep.mubr.bf16.mxu0 %v723_v45  ;;  %825 = vmatprep.mubr.msk.bf16.mxu1 %vm970_vm1, %v969_v37 }
  0x4b   :  { %512 = vmatpush1.bf16.xpose.msra.mxu0 %v908_v47  ;;  %812 = vmatpush3.bf16.xpose.msra.mxu1 %v424_v48 }
  0x4c   :  { %513 = vmatprep.subr.bf16.mxu0 %v914_v49  ;;  %813 = vmatprep.subr.bf16.mxu1 %v969_v37 }
  0x53   :  { %514 = vmatpush1.bf16.xpose.msra.mxu0 %v912_v51  ;;  %814 = vmatpush3.bf16.xpose.msra.mxu1 %v421_v52 }
  0x54   :  { %515 = vmatprep.subr.bf16.mxu0 %v918_v53  ;;  %815 = vmatprep.subr.bf16.mxu1 %v969_v37 }
  0x5b   :  { %516 = vmatpush1.bf16.xpose.msra.mxu0 %v916_v55  ;;  %816 = vmatpush3.bf16.xpose.msra.mxu1 %v418_v56 }
  0x5c   :  { %517 = vmatprep.subr.bf16.mxu0 %v922_v57  ;;  %817 = vmatprep.subr.bf16.mxu1 %v969_v37 }
  0x63   :  { %518 = vmatpush1.bf16.xpose.msra.mxu0 %v920_v59  ;;  %818 = vmatpush3.bf16.xpose.msra.mxu1 %v415_v60 }
  0x64   :  { %519 = vmatprep.subr.bf16.mxu0 %v926_v61  ;;  %819 = vmatprep.subr.bf16.mxu1 %v969_v37 }
  0x6b   :  { %520 = vmatpush1.bf16.xpose.msra.mxu0 %v924_v63  ;;  %820 = vmatpush3.bf16.xpose.msra.mxu1 %v412_v0 }
  0x6c   :  { %521 = vmatprep.subr.bf16.mxu0 %v930_v1  ;;  %821 = vmatprep.subr.bf16.mxu1 %v969_v37 }
  0x73   :  { %522 = vmatpush1.bf16.xpose.msra.mxu0 %v928_v3  ;;  %822 = vmatpush3.bf16.xpose.msra.mxu1 %v409_v4 }
  0x74   :  { %523 = vmatprep.subr.bf16.mxu0 %v934_v5  ;;  %823 = vmatprep.subr.bf16.mxu1 %v969_v37 }
  0x7b   :  { %524 = vmatpush1.bf16.xpose.msra.mxu0 %v932_v7  ;;  %824 = vmatpush3.bf16.xpose.msra.mxu1 %v406_v8 }
  0x7c   :  { %829 = vmatprep.subr.bf16.mxu0 %v969_v37 }
  0x82   :  { %542 = vmatmul.mubr.bf16.vlgmr.msra.gmra.mxu0 %v722_v9  ;;  %826 = vmatmul.mubr.msk.bf16.vlgmr.msra.gmra.mxu1 %vm401_vm0, %v938_v10 }
  0x83   :  { %845 = vmatprep.mubr.msk.bf16.mxu0 %vm970_vm1, %v969_v37  ;;  %830 = vmatpush3.bf16.xpose.msra.mxu0 %v939_v11 }
  0x84   :  { %831 = vmatprep.subr.bf16.mxu0 %v969_v37 }
  0x8b   :  { %832 = vmatpush3.bf16.xpose.msra.mxu0 %v940_v12 }
  0x8c   :  { %833 = vmatprep.subr.bf16.mxu0 %v969_v37 }
  0x93   :  { %834 = vmatpush3.bf16.xpose.msra.mxu0 %v941_v13 }
  0x94   :  { %835 = vmatprep.subr.bf16.mxu0 %v969_v37 }
  0x9b   :  { %836 = vmatpush3.bf16.xpose.msra.mxu0 %v942_v14 }
  0x9c   :  { %837 = vmatprep.subr.bf16.mxu0 %v969_v37 }
  0xa3   :  { %838 = vmatpush3.bf16.xpose.msra.mxu0 %v943_v15 }
  0xa4   :  { %839 = vmatprep.subr.bf16.mxu0 %v969_v37 }
  0xab   :  { %840 = vmatpush3.bf16.xpose.msra.mxu0 %v944_v16 }
  0xac   :  { %841 = vmatprep.subr.bf16.mxu0 %v969_v37 }
  0xb3   :  { %842 = vmatpush3.bf16.xpose.msra.mxu0 %v945_v17 }
  0xb4   :  { %843 = vmatprep.subr.bf16.mxu0 %v969_v37 }
  0xbb   :  { %844 = vmatpush3.bf16.xpose.msra.mxu0 %v946_v18 }
 0x102   :  { %v463_v19 = vpop.f32.mrf.mxu0  ;;  %v503_v20 = vpop.f32.mrf.mxu1 }
 0x103   :  { %v464_v28 = vadd.f32 %v717_v27, %v463_v19 }
 0x104   :  { %v465_v21 = vpop.f32.mrf.mxu0  ;;  %v505_v22 = vpop.f32.mrf.mxu1 }
 0x105   :  { %v504_v29 = vadd.f32 %v503_v20, %v464_v28 }
 0x106   :  { %v466_v23 = vpop.f32.mrf.mxu0  ;;  %v506_v24 = vpop.f32.mrf.mxu1 }
 0x108   :  { %v467_v25 = vpop.f32.mrf.mxu0  ;;  %v507_v26 = vpop.f32.mrf.mxu1 }
 0x142   :  { %v543_v30 = vpop.f32.mrf.mxu0  ;;  %v583_v31 = vpop.f32.mrf.mxu1 }
 0x143   :  { %v544_v32 = vadd.f32 %v543_v30, %v504_v29 }
 0x144   :  { %v545_v33 = vpop.f32.mrf.mxu0  ;;  %v827_v34 = vpop.f32.mrf.mxu1 }
 0x145   :  { %v584_v35 = vadd.f32 %v583_v31, %v544_v32 }
 0x146   :  { %v546_v36 = vpop.f32.mrf.mxu0  ;;  %v586_v37 = vpop.f32.mrf.mxu1 }
 0x147   :  { %v589_v38 = vmax.f32 %v584_v35, 0.0 }
 0x148   :  { %v547_v39 = vpop.f32.mrf.mxu0  ;;  %v828_v40 = vpop.f32.mrf.mxu1 }
 0x149   :  { %v590_v41 = vpack.c.bf16 %v589_v38, %v589_v38 }
 0x14b   :  { %846 = vmatmul.mubr.bf16.vlgmr.msra.gmra.mxu0 %v590_v41 }
 0x20b   :  { %v696_v43 = vpop.f32.mrf.mxu0 }
 0x20c   :  { %v697_v44 = vadd.f32 %v782_v42, %v696_v43 }
 0x20d   :  { %v847_v45 = vpop.f32.mrf.mxu0 }
 0x20e   :  { %702 = vst [vmem:[#allocation2] sm:$0xff] %v697_v44 }
 0x20f   :  { %v699_v46 = vpop.f32.mrf.mxu0 }
 0x210   :  { %958 = shalt.err (!%p955_p4)
}
 0x211   :  { %712 = dma.vmem_to_hbm [thread:$0]  %s710_s30, 128, %s1255_s5, [#allocation3]   ;;  %v848_v47 = vpop.f32.mrf.mxu0 }
 0x212   :  { %967 = dma.done.wait [#allocation3], 128  }
 0x213   :  { %968 = vsyncadd [#allocation3], 4294967168 }
 0x214   :  { %716 = vsyncpa [#allocation3], 1 }

</bundles_post_ra>
